<compile_context>
chip_gen: v7x
topology: tpu7x:2x2x1
jax: 0.10.0
libtpu: 0.0.40
codegen_flags: <defaults>
</compile_context>

<pallas_src>
import math
import jax
import jax.numpy as jnp
from jax.experimental import pallas as pl
from jax.experimental.pallas import tpu as pltpu

HIDDEN = 128          # MLPBase hidden_size
OUT_LANES = 128       # lane-dense output slab width (>= 2 + num_outputs)


# ----------------------------------------------------------------------------
# Kernel: 3 fused matmuls, one lane-dense output slab per batch tile.
# ----------------------------------------------------------------------------
def policy_act_kernel(x_ref, w1_ref, b1_ref, w2_ref, b2_ref, wh_ref, bh_ref,
                      out_ref):
    x = x_ref[...]
    # fused critic||actor layer 1 : (TILE_B, 2H)
    h1 = jnp.tanh(jnp.dot(x, w1_ref[...], preferred_element_type=jnp.float32)
                  + b1_ref[...])
    # fused (block-diagonal) layer 2 : (TILE_B, 2H)
    h2 = jnp.tanh(jnp.dot(h1, w2_ref[...], preferred_element_type=jnp.float32)
                  + b2_ref[...])
    # packed head -> [value | mean(action) | logp_const | zeros] : (TILE_B, 128)
    out_ref[...] = (jnp.dot(h2, wh_ref[...], preferred_element_type=jnp.float32)
                    + bh_ref[...]).astype(out_ref.dtype)


# ----------------------------------------------------------------------------
# Parameter construction (mirrors PyTorch init) and packing for the kernel.
# ----------------------------------------------------------------------------
def init_normc(key, out_features, in_features):
    """PyTorch init_normc_: N(0,1) rows, normalized so each row has unit L2 norm."""
    w = jax.random.normal(key, (out_features, in_features), dtype=jnp.float32)
    w = w / jnp.sqrt(jnp.sum(w ** 2, axis=1, keepdims=True))
    return w


def make_params(num_inputs, hidden_size, num_outputs, seed=0):
    keys = jax.random.split(jax.random.PRNGKey(seed), 6)
    return {
        # weights stored transposed: (in, out).  All biases start at 0.
        "wc1": init_normc(keys[0], hidden_size, num_inputs).T,
        "bc1": jnp.zeros((1, hidden_size), jnp.float32),
        "wc2": init_normc(keys[1], hidden_size, hidden_size).T,
        "bc2": jnp.zeros((1, hidden_size), jnp.float32),
        "wv":  init_normc(keys[2], 1, hidden_size).T,
        "bv":  jnp.zeros((1, 1), jnp.float32),
        "wa1": init_normc(keys[3], hidden_size, num_inputs).T,
        "ba1": jnp.zeros((1, hidden_size), jnp.float32),
        "wa2": init_normc(keys[4], hidden_size, hidden_size).T,
        "ba2": jnp.zeros((1, hidden_size), jnp.float32),
        "wm":  init_normc(keys[5], num_outputs, hidden_size).T,
        "bm":  jnp.zeros((1, num_outputs), jnp.float32),
        "logstd": jnp.zeros((1, num_outputs), jnp.float32),  # AddBias init 0
    }


def pack_params(params, num_outputs):
    """Fuse critic/actor weights and pack the head into a lane-dense slab."""
    num_inputs, H = params["wc1"].shape
    A = num_outputs
    assert 2 + A <= OUT_LANES, "action dim too large for the 128-lane output slab"

    # layer 1: critic || actor  ->  (num_inputs, 2H)
    w1 = jnp.concatenate([params["wc1"], params["wa1"]], axis=1)
    b1 = jnp.concatenate([params["bc1"], params["ba1"]], axis=1)

    # layer 2: block-diagonal     ->  (2H, 2H)
    z = jnp.zeros((H, H), jnp.float32)
    w2 = jnp.block([[params["wc2"], z],
                    [z, params["wa2"]]])
    b2 = jnp.concatenate([params["bc2"], params["ba2"]], axis=1)

    # head: lane 0 = value (critic half), lanes 1..A = mean (actor half),
    #       lane 1+A = deterministic log-prob constant, remaining lanes = 0.
    wh = jnp.zeros((2 * H, OUT_LANES), jnp.float32)
    wh = wh.at[:H, 0:1].set(params["wv"])
    wh = wh.at[H:, 1:1 + A].set(params["wm"])

    # action == mean  =>  log_prob = -(sum(logstd) + 0.5*A*log(2*pi)), a constant.
    logp_const = -(jnp.sum(params["logstd"]) + 0.5 * A * math.log(2.0 * math.pi))
    bh = jnp.zeros((1, OUT_LANES), jnp.float32)
    bh = bh.at[0, 0].set(params["bv"][0, 0])
    bh = bh.at[0, 1:1 + A].set(params["bm"][0])
    bh = bh.at[0, 1 + A].set(logp_const)

    return {"w1": w1, "b1": b1, "w2": w2, "b2": b2, "wh": wh, "bh": bh,
            "num_inputs": num_inputs, "num_outputs": A}


# ----------------------------------------------------------------------------
# Wrapper: batch-gridded pallas_call, weights VMEM-resident across all tiles.
# ----------------------------------------------------------------------------
def policy_act(inputs, rnn_hxs, masks, packed, *, tile_b=256):
    """Equivalent of Policy.act(inputs, rnn_hxs, masks, deterministic=True)."""
    del masks  # non-recurrent base: masks unused
    B, num_inputs = inputs.shape
    A = packed["num_outputs"]
    H2 = packed["w1"].shape[1]  # 2 * hidden

    # batch tile: multiple of 8 (f32 sublane), capped at tile_b
    tb = min(tile_b, ((B + 7) // 8) * 8)
    num_tiles = pl.cdiv(B, tb)
    b_pad = num_tiles * tb
    x = inputs if b_pad == B else jnp.pad(inputs, ((0, b_pad - B), (0, 0)))

    flops = 2 * b_pad * (num_inputs * H2 + H2 * H2 + H2 * OUT_LANES)
    transcendentals = 2 * b_pad * H2  # two tanh layers
    bytes_accessed = 4 * (b_pad * num_inputs + b_pad * OUT_LANES
                          + num_inputs * H2 + H2 * H2 + H2 * OUT_LANES
                          + 2 * H2 + OUT_LANES)

    def resident(shape):  # weights/biases: same block for every grid step
        return pl.BlockSpec(shape, lambda i: (0, 0))

    slab = pl.pallas_call(
        policy_act_kernel,
        out_shape=jax.ShapeDtypeStruct((b_pad, OUT_LANES), jnp.float32),
        grid=(num_tiles,),
        in_specs=[
            pl.BlockSpec((tb, num_inputs), lambda i: (i, 0)),   # inputs (tiled)
            resident((num_inputs, H2)), resident((1, H2)),      # w1, b1
            resident((H2, H2)), resident((1, H2)),              # w2, b2
            resident((H2, OUT_LANES)), resident((1, OUT_LANES)),  # wh, bh
        ],
        out_specs=pl.BlockSpec((tb, OUT_LANES), lambda i: (i, 0)),
        compiler_params=pltpu.CompilerParams(
            dimension_semantics=("parallel",)),
        cost_estimate=pl.CostEstimate(
            flops=flops, transcendentals=transcendentals,
            bytes_accessed=bytes_accessed),
    )(x, packed["w1"], packed["b1"], packed["w2"], packed["b2"],
      packed["wh"], packed["bh"])

    value = slab[:B, 0:1]
    action = slab[:B, 1:1 + A]
    log_probs = slab[:B, 1 + A:2 + A]
    return value, action, log_probs, rnn_hxs


# ----------------------------------------------------------------------------
# Plain-JAX reference (mirrors the PyTorch forward) for validation.
# ----------------------------------------------------------------------------
def policy_act_ref(inputs, rnn_hxs, masks, params):
    del masks
    x = inputs
    hc = jnp.tanh(x @ params["wc1"] + params["bc1"])
    hc = jnp.tanh(hc @ params["wc2"] + params["bc2"])
    value = hc @ params["wv"] + params["bv"]
    ha = jnp.tanh(x @ params["wa1"] + params["ba1"])
    ha = jnp.tanh(ha @ params["wa2"] + params["ba2"])
    mean = ha @ params["wm"] + params["bm"]
    action = mean
    logstd = params["logstd"]
    logp = (-0.5 * (action - mean) ** 2 * jnp.exp(-2.0 * logstd)
            - logstd - 0.5 * math.log(2.0 * math.pi))
    return value, action, jnp.sum(logp, axis=-1, keepdims=True), rnn_hxs


if __name__ == "__main__":
    # small shapes: obs_shape=(32,), action_space.shape=(4,), batch=2, hidden=128
    B, NUM_INPUTS, NUM_OUTPUTS = 2, 32, 4

    key = jax.random.PRNGKey(0)
    k_x, _ = jax.random.split(key)
    inputs = jax.random.normal(k_x, (B, NUM_INPUTS), dtype=jnp.float32)
    rnn_hxs = jnp.zeros((B, 1), jnp.float32)   # recurrent_hidden_state_size == 1
    masks = jnp.ones((B, 1), jnp.float32)

    params = make_params(NUM_INPUTS, HIDDEN, NUM_OUTPUTS, seed=0)
    packed = pack_params(params, NUM_OUTPUTS)

    value, action, logp, hxs = policy_act(inputs, rnn_hxs, masks, packed)
    jax.block_until_ready((value, action, logp, hxs))

    v_ref, a_ref, lp_ref, _ = policy_act_ref(inputs, rnn_hxs, masks, params)
    assert jnp.allclose(value, v_ref, atol=1e-5), "value mismatch"
    assert jnp.allclose(action, a_ref, atol=1e-5), "action mismatch"
    assert jnp.allclose(logp, lp_ref, atol=1e-5), "log_prob mismatch"

    print("KERNEL_OK")
</pallas_src>

<mosaic_0001>
module attributes {stable_mosaic.version = 11 : i64} {
  func.func @policy_act_kernel(%arg0: i32, %arg1: memref<8x32xf32, #tpu.memory_space<vmem>>, %arg2: memref<32x256xf32, #tpu.memory_space<vmem>>, %arg3: memref<1x256xf32, #tpu.memory_space<vmem>>, %arg4: memref<256x256xf32, #tpu.memory_space<vmem>>, %arg5: memref<1x256xf32, #tpu.memory_space<vmem>>, %arg6: memref<256x128xf32, #tpu.memory_space<vmem>>, %arg7: memref<1x128xf32, #tpu.memory_space<vmem>>, %arg8: memref<8x128xf32, #tpu.memory_space<vmem>>) attributes {dimension_semantics = [#tpu.dimension_semantics<parallel>], iteration_bounds = array<i64: 1>, scalar_prefetch = 0 : i64, scratch_operands = 0 : i64, tpu.core_type = #tpu.core_type<tc>, window_params = [{transform_indices = @transform_0, window_bounds = array<i64: 8, 32>}, {pipeline_mode = #tpu.pipeline_mode<synchronous>, transform_indices = @transform_1, window_bounds = array<i64: 32, 256>}, {pipeline_mode = #tpu.pipeline_mode<synchronous>, transform_indices = @transform_2, window_bounds = array<i64: 1, 256>}, {pipeline_mode = #tpu.pipeline_mode<synchronous>, transform_indices = @transform_3, window_bounds = array<i64: 256, 256>}, {pipeline_mode = #tpu.pipeline_mode<synchronous>, transform_indices = @transform_4, window_bounds = array<i64: 1, 256>}, {pipeline_mode = #tpu.pipeline_mode<synchronous>, transform_indices = @transform_5, window_bounds = array<i64: 256, 128>}, {pipeline_mode = #tpu.pipeline_mode<synchronous>, transform_indices = @transform_6, window_bounds = array<i64: 1, 128>}, {transform_indices = @transform_7, window_bounds = array<i64: 8, 128>}]} {
    %c0 = arith.constant 0 : index
    %c0_0 = arith.constant 0 : index
    %0 = vector.load %arg1[%c0, %c0_0] : memref<8x32xf32, #tpu.memory_space<vmem>>, vector<8x32xf32>
    %c0_1 = arith.constant 0 : index
    %c0_2 = arith.constant 0 : index
    %1 = vector.load %arg2[%c0_1, %c0_2] : memref<32x256xf32, #tpu.memory_space<vmem>>, vector<32x256xf32>
    %cst = arith.constant dense<0.000000e+00> : vector<8x256xf32>
    %2 = tpu.matmul %0, %1, %cst {dimension_numbers = #tpu.dot_dimension_numbers<[1], [0], [0], [1], [0, 0, 1, 1], [], []>} : vector<8x32xf32>, vector<32x256xf32>, vector<8x256xf32> -> vector<8x256xf32>
    %c0_3 = arith.constant 0 : index
    %c0_4 = arith.constant 0 : index
    %3 = vector.load %arg3[%c0_3, %c0_4] : memref<1x256xf32, #tpu.memory_space<vmem>>, vector<1x256xf32>
    %4 = vector.broadcast %3 : vector<1x256xf32> to vector<8x256xf32>
    %5 = arith.addf %2, %4 : vector<8x256xf32>
    %6 = math.tanh %5 : vector<8x256xf32>
    %c0_5 = arith.constant 0 : index
    %c0_6 = arith.constant 0 : index
    %7 = vector.load %arg4[%c0_5, %c0_6] : memref<256x256xf32, #tpu.memory_space<vmem>>, vector<256x256xf32>
    %cst_7 = arith.constant dense<0.000000e+00> : vector<8x256xf32>
    %8 = tpu.matmul %6, %7, %cst_7 {dimension_numbers = #tpu.dot_dimension_numbers<[1], [0], [0], [1], [0, 0, 1, 1], [], []>} : vector<8x256xf32>, vector<256x256xf32>, vector<8x256xf32> -> vector<8x256xf32>
    %c0_8 = arith.constant 0 : index
    %c0_9 = arith.constant 0 : index
    %9 = vector.load %arg5[%c0_8, %c0_9] : memref<1x256xf32, #tpu.memory_space<vmem>>, vector<1x256xf32>
    %10 = vector.broadcast %9 : vector<1x256xf32> to vector<8x256xf32>
    %11 = arith.addf %8, %10 : vector<8x256xf32>
    %12 = math.tanh %11 : vector<8x256xf32>
    %c0_10 = arith.constant 0 : index
    %c0_11 = arith.constant 0 : index
    %13 = vector.load %arg6[%c0_10, %c0_11] : memref<256x128xf32, #tpu.memory_space<vmem>>, vector<256x128xf32>
    %cst_12 = arith.constant dense<0.000000e+00> : vector<8x128xf32>
    %14 = tpu.matmul %12, %13, %cst_12 {dimension_numbers = #tpu.dot_dimension_numbers<[1], [0], [0], [1], [0, 0, 1, 1], [], []>} : vector<8x256xf32>, vector<256x128xf32>, vector<8x128xf32> -> vector<8x128xf32>
    %c0_13 = arith.constant 0 : index
    %c0_14 = arith.constant 0 : index
    %15 = vector.load %arg7[%c0_13, %c0_14] : memref<1x128xf32, #tpu.memory_space<vmem>>, vector<1x128xf32>
    %16 = vector.broadcast %15 : vector<1x128xf32> to vector<8x128xf32>
    %17 = arith.addf %14, %16 : vector<8x128xf32>
    %c0_15 = arith.constant 0 : index
    %c0_16 = arith.constant 0 : index
    %18 = vector.load %arg8[%c0_15, %c0_16] : memref<8x128xf32, #tpu.memory_space<vmem>>, vector<8x128xf32>
    tpu.vector_store %arg8[%c0_15, %c0_16], %17 {strides = array<i32>} : memref<8x128xf32, #tpu.memory_space<vmem>>, vector<8x128xf32>,
    return
  }
  func.func @transform_0(%arg0: i32) -> (i32, i32) {
    %c0_i32 = arith.constant 0 : i32
    %c0_i32_0 = arith.constant 0 : i32
    return %arg0, %c0_i32 : i32, i32
  }
  func.func @transform_1(%arg0: i32) -> (i32, i32) {
    %c0_i32 = arith.constant 0 : i32
    %c0_i32_0 = arith.constant 0 : i32
    %c0_i32_1 = arith.constant 0 : i32
    return %c0_i32, %c0_i32_0 : i32, i32
  }
  func.func @transform_2(%arg0: i32) -> (i32, i32) {
    %c0_i32 = arith.constant 0 : i32
    %c0_i32_0 = arith.constant 0 : i32
    %c0_i32_1 = arith.constant 0 : i32
    return %c0_i32, %c0_i32_0 : i32, i32
  }
  func.func @transform_3(%arg0: i32) -> (i32, i32) {
    %c0_i32 = arith.constant 0 : i32
    %c0_i32_0 = arith.constant 0 : i32
    %c0_i32_1 = arith.constant 0 : i32
    return %c0_i32, %c0_i32_0 : i32, i32
  }
  func.func @transform_4(%arg0: i32) -> (i32, i32) {
    %c0_i32 = arith.constant 0 : i32
    %c0_i32_0 = arith.constant 0 : i32
    %c0_i32_1 = arith.constant 0 : i32
    return %c0_i32, %c0_i32_0 : i32, i32
  }
  func.func @transform_5(%arg0: i32) -> (i32, i32) {
    %c0_i32 = arith.constant 0 : i32
    %c0_i32_0 = arith.constant 0 : i32
    %c0_i32_1 = arith.constant 0 : i32
    return %c0_i32, %c0_i32_0 : i32, i32
  }
  func.func @transform_6(%arg0: i32) -> (i32, i32) {
    %c0_i32 = arith.constant 0 : i32
    %c0_i32_0 = arith.constant 0 : i32
    %c0_i32_1 = arith.constant 0 : i32
    return %c0_i32, %c0_i32_0 : i32, i32
  }
  func.func @transform_7(%arg0: i32) -> (i32, i32) {
    %c0_i32 = arith.constant 0 : i32
    %c0_i32_0 = arith.constant 0 : i32
    return %arg0, %c0_i32 : i32, i32
  }
}

</mosaic_0001>

<bundles_post_ra>
// kernel: tpu_custom_call.1
= control target key start
LH: loop header
LB: loop body
LE: loop exit
PB: predicated region body
PF: predicated region fallthrough
CT: control target
= control target key end

     0   :  { %12 = vsyncpa [#allocation3], 0  ;;  %s856_s0 = inlined_call_operand.hbm [shape: f32[8,32], index: 0, kind: input, shape index: {}]   ;;  %s857_s1 = inlined_call_operand.hbm [shape: f32[32,256], index: 1, kind: input, shape index: {}]   ;;  %s858_s2 = inlined_call_operand.vmem [shape: f32[1,256], index: 2, kind: input, shape index: {}]   ;;  %s859_s3 = inlined_call_operand.hbm [shape: f32[256,256], index: 3, kind: input, shape index: {}]   ;;  %s860_s4 = inlined_call_operand.vmem [shape: f32[1,256], index: 4, kind: input, shape index: {}]   ;;  %s861_s5 = inlined_call_operand.hbm [shape: f32[256,128], index: 5, kind: input, shape index: {}]   ;;  %s862_s6 = inlined_call_operand.vmem [shape: f32[1,128], index: 6, kind: input, shape index: {}]   ;;  %s863_s7 = inlined_call_operand.hbm [shape: f32[8,128], index: 7, kind: output, shape index: {}]  }
   0x1   :  { %13 = vsyncpa [#allocation6], 0 }
   0x2   :  { %14 = vsyncpa [#allocation9], 0 }
   0x3   :  { %15 = vsyncpa [#allocation4], 0  ;;  %s731_s24 = smov [#allocation5]   ;;  %s613_s28 = scalar_lea.hbm %s857_s1, 1024 }
   0x4   :  { %s31_s25 = sshll.u32 %s731_s24, 4  ;;  %p614_p0 = scmp.ne.s32.totalorder %s857_s1, %s613_s28  ;;  %s32_s25 = int_to_ptr.vmem [resolvable:$true] %s31_s25 }
   0x5   :  { %p617_p1 = scmp.lt.u32.totalorder %s613_s28, %s857_s1 }
   0x7   :  { %p619_p2 = pnand %p617_p1, %p614_p0 }
   0x9   :  { %622 = shalt.err (!%p619_p2)
}
   0xa   :  { %s623_s10 = scalar_lea.vmem %s32_s25, 1024  ;;  %p628_p4 = scmp.lt.s32.totalorder %s32_s25, %s32_s25 }
   0xb   :  { %p624_p3 = scmp.ne.s32.totalorder %s32_s25, %s623_s10  ;;  %p629_p5 = scmp.lt.s32.totalorder %s623_s10, %s623_s10 }
   0xd   :  { %p630_p6 = por %p629_p5, %p628_p4 }
   0xf   :  { %p631_p7 = pnand %p630_p6, %p624_p3 }
  0x11   :  { %634 = shalt.err (!%p631_p7)
}
  0x12   :  { %s732_s11 = smov 256   ;;  %s733_s12 = smov 16  }
  0x13   :  { %37 = dma.hbm_to_vmem [thread:$0]  %s857_s1, 1024, %s32_s25, [#allocation6], %s732_s11, %s732_s11, %s733_s12  }
  0x14   :  { %s734_s15 = smov [#allocation2]   ;;  %s735_s17 = smov [#allocation7]  }
  0x15   :  { %s22_s16 = sshll.u32 %s734_s15, 4  ;;  %s45_s18 = sshll.u32 %s735_s17, 4  ;;  %s23_s16 = int_to_ptr.vmem [resolvable:$true] %s22_s16  ;;  %s46_s18 = int_to_ptr.vmem [resolvable:$true] %s45_s18 }
  0x16   :  { %s635_s21 = scalar_lea.hbm %s856_s0, 128 }
  0x17   :  { %p636_p8 = scmp.ne.s32.totalorder %s856_s0, %s635_s21  ;;  %p639_p9 = scmp.lt.u32.totalorder %s635_s21, %s856_s0 }
  0x19   :  { %p641_p10 = pnand %p639_p9, %p636_p8 }
  0x1b   :  { %644 = shalt.err (!%p641_p10)
}
  0x1c   :  { %s645_s1 = scalar_lea.vmem %s23_s16, 128  ;;  %p650_p12 = scmp.lt.s32.totalorder %s23_s16, %s23_s16 }
  0x1d   :  { %p646_p11 = scmp.ne.s32.totalorder %s23_s16, %s645_s1  ;;  %p651_p13 = scmp.lt.s32.totalorder %s645_s1, %s645_s1 }
  0x1f   :  { %p652_p0 = por %p651_p13, %p650_p12 }
  0x21   :  { %p653_p1 = pnand %p652_p0, %p646_p11 }
  0x23   :  { %656 = shalt.err (!%p653_p1)
}
  0x24   :  { %25 = dma.hbm_to_vmem [thread:$0]  %s856_s0, 128, %s23_s16, [#allocation3]  }
  0x25   :  { %s657_s30 = scalar_lea.hbm %s859_s3, 8192 }
  0x26   :  { %p658_p2 = scmp.ne.s32.totalorder %s859_s3, %s657_s30  ;;  %p661_p3 = scmp.lt.u32.totalorder %s657_s30, %s859_s3 }
  0x28   :  { %p663_p4 = pnand %p661_p3, %p658_p2 }
  0x2a   :  { %666 = shalt.err (!%p663_p4)
}
  0x2b   :  { %s667_s14 = scalar_lea.vmem %s46_s18, 8192  ;;  %p672_p6 = scmp.lt.s32.totalorder %s46_s18, %s46_s18 }
  0x2c   :  { %p668_p5 = scmp.ne.s32.totalorder %s46_s18, %s667_s14  ;;  %p673_p7 = scmp.lt.s32.totalorder %s667_s14, %s667_s14 }
  0x2e   :  { %p674_p8 = por %p673_p7, %p672_p6 }
  0x30   :  { %p675_p9 = pnand %p674_p8, %p668_p5 }
  0x32   :  { %678 = shalt.err (!%p675_p9)
}
  0x33   :  { %51 = dma.hbm_to_vmem [thread:$0]  %s859_s3, 8192, %s46_s18, [#allocation6], %s732_s11, %s732_s11, %s733_s12  }
  0x34   :  { %s736_s16 = smov [#allocation8]   ;;  %s679_s21 = scalar_lea.hbm %s861_s5, 4096 }
  0x35   :  { %s59_s17 = sshll.u32 %s736_s16, 4  ;;  %p680_p10 = scmp.ne.s32.totalorder %s861_s5, %s679_s21  ;;  %s60_s17 = int_to_ptr.vmem [resolvable:$true] %s59_s17 }
  0x36   :  { %p683_p11 = scmp.lt.u32.totalorder %s679_s21, %s861_s5 }
  0x38   :  { %p685_p12 = pnand %p683_p11, %p680_p10 }
  0x3a   :  { %688 = shalt.err (!%p685_p12)
}
  0x3b   :  { %s689_s1 = scalar_lea.vmem %s60_s17, 4096  ;;  %p694_p0 = scmp.lt.s32.totalorder %s60_s17, %s60_s17 }
  0x3c   :  { %p690_p13 = scmp.ne.s32.totalorder %s60_s17, %s689_s1  ;;  %p695_p1 = scmp.lt.s32.totalorder %s689_s1, %s689_s1 }
  0x3e   :  { %p696_p2 = por %p695_p1, %p694_p0 }
  0x40   :  { %p697_p3 = pnand %p696_p2, %p690_p13 }
  0x42   :  { %700 = shalt.err (!%p697_p3)
}
  0x43   :  { %s737_s3 = smov 128   ;;  %s738_s11 = smov 8  }
  0x44   :  { %65 = dma.hbm_to_vmem [thread:$0]  %s861_s5, 4096, %s60_s17, [#allocation9], %s737_s3, %s737_s3, %s738_s11  }
  0x45   :  { %723 = dma.done.wait [#allocation3], 128  }
  0x46   :  { %724 = vsyncadd [#allocation3], 4294967168 }
  0x47   :  { %725 = dma.done.wait [#allocation6], 9216  }
  0x48   :  { %726 = vsyncadd [#allocation6], 4294958080 }
  0x49   :  { %727 = dma.done.wait [#allocation9], 4096  }
  0x4a   :  { %728 = vsyncadd [#allocation9], 4294963200  ;;  %v739_v0 = vmov 0.0   ;;  %v82_v1 = vld [vmem:[#allocation5 + $0x8] sm:$0xff]  ;;  %v84_v2 = vld [vmem:[#allocation5 + $0x18] sm:$0xff]  ;;  %vm101_vm0 = vcmask 261120  }
  0x4b   :  { %169 = vmatprep.mubr.f32.mxu0 %v739_v0  ;;  %v81_v3 = vld [vmem:[#allocation5] sm:$0xff]  ;;  %v491_v4 = vpack.c.bf16 %v84_v2, %v82_v1  ;;  %v83_v5 = vld [vmem:[#allocation5 + $0x10] sm:$0xff]  ;;  %v86_v6 = vld [vmem:[#allocation5 + $0x28] sm:$0xff]  ;;  %s740_s30 = smov [#allocation10]  }
  0x4c   :  { %v88_v7 = vld [vmem:[#allocation5 + $0x38] sm:$0xff]  ;;  %v493_v8 = vpack.c.bf16 %v83_v5, %v81_v3  ;;  %v85_v10 = vld [vmem:[#allocation5 + $0x20] sm:$0xff]  ;;  %v87_v11 = vld [vmem:[#allocation5 + $0x30] sm:$0xff] }
  0x4d   :  { %v495_v9 = vpack.c.bf16 %v88_v7, %v86_v6  ;;  %492 = vmatprep.subr.bf16.mxu0 %v491_v4  ;;  %v179_v12 = vld [vmem:[#allocation7 + $0x8] sm:$0xff]  ;;  %v181_v13 = vld [vmem:[#allocation7 + $0x18] sm:$0xff]  ;;  %v178_v14 = vld [vmem:[#allocation7] sm:$0xff]  ;;  %v497_v15 = vpack.c.bf16 %v87_v11, %v85_v10 }
  0x4e   :  { %494 = vmatpush1.bf16.msra.mxu0 %v493_v8  ;;  %v499_v16 = vpack.c.bf16 %v181_v13, %v179_v12  ;;  %v180_v17 = vld [vmem:[#allocation7 + $0x10] sm:$0xff]  ;;  %v183_v18 = vld [vmem:[#allocation7 + $0x28] sm:$0xff]  ;;  %v185_v19 = vld [vmem:[#allocation7 + $0x38] sm:$0xff] }
  0x4f   :  { %496 = vmatprep.subr.bf16.mxu0 %v495_v9  ;;  %v501_v20 = vpack.c.bf16 %v180_v17, %v178_v14  ;;  %v503_v21 = vpack.c.bf16 %v185_v19, %v183_v18  ;;  %v182_v22 = vld [vmem:[#allocation7 + $0x20] sm:$0xff]  ;;  %v184_v23 = vld [vmem:[#allocation7 + $0x30] sm:$0xff]  ;;  %v187_v24 = vld [vmem:[#allocation7 + $0x48] sm:$0xff] }
  0x50   :  { %500 = vmatprep.subr.bf16.mxu1 %v499_v16  ;;  %v189_v25 = vld [vmem:[#allocation7 + $0x58] sm:$0xff]  ;;  %v505_v26 = vpack.c.bf16 %v184_v23, %v182_v22  ;;  %v186_v29 = vld [vmem:[#allocation7 + $0x40] sm:$0xff]  ;;  %v188_v30 = vld [vmem:[#allocation7 + $0x50] sm:$0xff] }
  0x51   :  { %502 = vmatpush1.bf16.msra.mxu1 %v501_v20  ;;  %v80_v27 = vld [vmem:[#allocation2] sm:$0xff]  ;;  %v507_v28 = vpack.c.bf16 %v189_v25, %v187_v24  ;;  %v191_v31 = vld [vmem:[#allocation7 + $0x68] sm:$0xff]  ;;  %v509_v33 = vpack.c.bf16 %v188_v30, %v186_v29  ;;  %v190_v35 = vld [vmem:[#allocation7 + $0x60] sm:$0xff] }
  0x52   :  { %498 = vmatpush1.bf16.msra.mxu0 %v497_v15  ;;  %504 = vmatprep.subr.bf16.mxu1 %v503_v21  ;;  %v193_v32 = vld [vmem:[#allocation7 + $0x78] sm:$0xff]  ;;  %v192_v36 = vld [vmem:[#allocation7 + $0x70] sm:$0xff]  ;;  %v195_v37 = vld [vmem:[#allocation7 + $0x88] sm:$0xff] }
  0x53   :  { %v511_v34 = vpack.c.bf16 %v193_v32, %v191_v31  ;;  %v197_v38 = vld [vmem:[#allocation7 + $0x98] sm:$0xff]  ;;  %v513_v39 = vpack.c.bf16 %v192_v36, %v190_v35  ;;  %v194_v41 = vld [vmem:[#allocation7 + $0x80] sm:$0xff]  ;;  %v196_v42 = vld [vmem:[#allocation7 + $0x90] sm:$0xff] }
  0x54   :  { %v515_v40 = vpack.c.bf16 %v197_v38, %v195_v37  ;;  %v199_v43 = vld [vmem:[#allocation7 + $0xa8] sm:$0xff]  ;;  %v201_v44 = vld [vmem:[#allocation7 + $0xb8] sm:$0xff]  ;;  %v517_v45 = vpack.c.bf16 %v196_v42, %v194_v41  ;;  %v198_v47 = vld [vmem:[#allocation7 + $0xa0] sm:$0xff] }
  0x55   :  { %454 = vmatmul.mubr.msk.f32.vlgmr.msra.gmra.mrb[0].mxu0 %vm101_vm0, %v80_v27  ;;  %506 = vmatpush1.bf16.msra.mxu1 %v505_v26  ;;  %v519_v46 = vpack.c.bf16 %v201_v44, %v199_v43  ;;  %v200_v48 = vld [vmem:[#allocation7 + $0xb0] sm:$0xff]  ;;  %v203_v49 = vld [vmem:[#allocation7 + $0xc8] sm:$0xff]  ;;  %v205_v50 = vld [vmem:[#allocation7 + $0xd8] sm:$0xff] }
  0x56   :  { %508 = vmatprep.subr.bf16.mxu1 %v507_v28  ;;  %v521_v51 = vpack.c.bf16 %v200_v48, %v198_v47  ;;  %v523_v52 = vpack.c.bf16 %v205_v50, %v203_v49  ;;  %v202_v53 = vld [vmem:[#allocation7 + $0xc0] sm:$0xff]  ;;  %v204_v54 = vld [vmem:[#allocation7 + $0xd0] sm:$0xff]  ;;  %v207_v55 = vld [vmem:[#allocation7 + $0xe8] sm:$0xff] }
  0x57   :  { %v209_v56 = vld [vmem:[#allocation7 + $0xf8] sm:$0xff]  ;;  %v525_v57 = vpack.c.bf16 %v204_v54, %v202_v53  ;;  %v206_v59 = vld [vmem:[#allocation7 + $0xe0] sm:$0xff]  ;;  %v208_v60 = vld [vmem:[#allocation7 + $0xf0] sm:$0xff] }
  0x58   :  { %v527_v58 = vpack.c.bf16 %v209_v56, %v207_v55  ;;  %v211_v61 = vld [vmem:[#allocation7 + $0x108] sm:$0xff]  ;;  %v213_v62 = vld [vmem:[#allocation7 + $0x118] sm:$0xff]  ;;  %v529_v63 = vpack.c.bf16 %v208_v60, %v206_v59  ;;  %v210_v1 = vld [vmem:[#allocation7 + $0x100] sm:$0xff] }
  0x59   :  { %510 = vmatpush1.bf16.msra.mxu1 %v509_v33  ;;  %v531_v0 = vpack.c.bf16 %v213_v62, %v211_v61  ;;  %v212_v2 = vld [vmem:[#allocation7 + $0x110] sm:$0xff]  ;;  %v215_v3 = vld [vmem:[#allocation7 + $0x128] sm:$0xff]  ;;  %v217_v4 = vld [vmem:[#allocation7 + $0x138] sm:$0xff] }
  0x5a   :  { %512 = vmatprep.subr.bf16.mxu1 %v511_v34  ;;  %v533_v5 = vpack.c.bf16 %v212_v2, %v210_v1  ;;  %v535_v6 = vpack.c.bf16 %v217_v4, %v215_v3  ;;  %v214_v7 = vld [vmem:[#allocation7 + $0x120] sm:$0xff]  ;;  %v216_v8 = vld [vmem:[#allocation7 + $0x130] sm:$0xff]  ;;  %v219_v9 = vld [vmem:[#allocation7 + $0x148] sm:$0xff] }
  0x5b   :  { %v221_v10 = vld [vmem:[#allocation7 + $0x158] sm:$0xff]  ;;  %v537_v11 = vpack.c.bf16 %v216_v8, %v214_v7  ;;  %v218_v13 = vld [vmem:[#allocation7 + $0x140] sm:$0xff]  ;;  %v220_v14 = vld [vmem:[#allocation7 + $0x150] sm:$0xff] }
  0x5c   :  { %v539_v12 = vpack.c.bf16 %v221_v10, %v219_v9  ;;  %v223_v15 = vld [vmem:[#allocation7 + $0x168] sm:$0xff]  ;;  %v225_v16 = vld [vmem:[#allocation7 + $0x178] sm:$0xff]  ;;  %v541_v17 = vpack.c.bf16 %v220_v14, %v218_v13  ;;  %v222_v19 = vld [vmem:[#allocation7 + $0x160] sm:$0xff] }
  0x5d   :  { %514 = vmatpush1.bf16.msra.mxu1 %v513_v39  ;;  %v543_v18 = vpack.c.bf16 %v225_v16, %v223_v15  ;;  %v224_v20 = vld [vmem:[#allocation7 + $0x170] sm:$0xff]  ;;  %v227_v22 = vld [vmem:[#allocation7 + $0x188] sm:$0xff]  ;;  %v229_v23 = vld [vmem:[#allocation7 + $0x198] sm:$0xff] }
  0x5e   :  { %516 = vmatprep.subr.bf16.mxu1 %v515_v40  ;;  %v545_v21 = vpack.c.bf16 %v224_v20, %v222_v19  ;;  %v547_v24 = vpack.c.bf16 %v229_v23, %v227_v22  ;;  %v226_v25 = vld [vmem:[#allocation7 + $0x180] sm:$0xff]  ;;  %v228_v26 = vld [vmem:[#allocation7 + $0x190] sm:$0xff]  ;;  %v231_v28 = vld [vmem:[#allocation7 + $0x1a8] sm:$0xff] }
  0x5f   :  { %v549_v27 = vpack.c.bf16 %v228_v26, %v226_v25  ;;  %v233_v29 = vld [vmem:[#allocation7 + $0x1b8] sm:$0xff]  ;;  %v230_v31 = vld [vmem:[#allocation7 + $0x1a0] sm:$0xff]  ;;  %v232_v32 = vld [vmem:[#allocation7 + $0x1b0] sm:$0xff] }
  0x60   :  { %v551_v30 = vpack.c.bf16 %v233_v29, %v231_v28  ;;  %v553_v33 = vpack.c.bf16 %v232_v32, %v230_v31  ;;  %v235_v34 = vld [vmem:[#allocation7 + $0x1c8] sm:$0xff]  ;;  %v237_v35 = vld [vmem:[#allocation7 + $0x1d8] sm:$0xff]  ;;  %v234_v36 = vld [vmem:[#allocation7 + $0x1c0] sm:$0xff] }
  0x61   :  { %518 = vmatpush1.bf16.msra.mxu1 %v517_v45  ;;  %v555_v37 = vpack.c.bf16 %v237_v35, %v235_v34  ;;  %v236_v38 = vld [vmem:[#allocation7 + $0x1d0] sm:$0xff]  ;;  %v239_v39 = vld [vmem:[#allocation7 + $0x1e8] sm:$0xff]  ;;  %v241_v40 = vld [vmem:[#allocation7 + $0x1f8] sm:$0xff] }
  0x62   :  { %520 = vmatprep.subr.bf16.mxu1 %v519_v46  ;;  %v557_v41 = vpack.c.bf16 %v236_v38, %v234_v36  ;;  %v559_v42 = vpack.c.bf16 %v241_v40, %v239_v39  ;;  %v238_v43 = vld [vmem:[#allocation7 + $0x1e0] sm:$0xff]  ;;  %v240_v44 = vld [vmem:[#allocation7 + $0x1f0] sm:$0xff]  ;;  %v344_v47 = vld [vmem:[#allocation8 + $0x88] sm:$0xff] }
  0x63   :  { %v561_v45 = vpack.c.bf16 %v240_v44, %v238_v43  ;;  %v343_v46 = vld [vmem:[#allocation8 + $0x80] sm:$0xff]  ;;  %v328_v50 = vld [vmem:[#allocation8 + $0x8] sm:$0xff]  ;;  %v329_v55 = vld [vmem:[#allocation8 + $0x10] sm:$0xff] }
  0x64   :  { %v327_v48 = vld [vmem:[#allocation8] sm:$0xff]  ;;  %v563_v49 = vpack.c.bf16 %v344_v47, %v343_v46  ;;  %v330_v56 = vld [vmem:[#allocation8 + $0x18] sm:$0xff]  ;;  %v332_v62 = vld [vmem:[#allocation8 + $0x28] sm:$0xff] }
  0x65   :  { %522 = vmatpush1.bf16.msra.mxu1 %v521_v51  ;;  %v345_v51 = vld [vmem:[#allocation8 + $0x90] sm:$0xff]  ;;  %v565_v53 = vpack.c.bf16 %v328_v50, %v327_v48  ;;  %v569_v59 = vpack.c.bf16 %v330_v56, %v329_v55  ;;  %v331_v61 = vld [vmem:[#allocation8 + $0x20] sm:$0xff]  ;;  %v334_v4 = vld [vmem:[#allocation8 + $0x38] sm:$0xff] }
  0x66   :  { %524 = vmatprep.subr.bf16.mxu1 %v523_v52  ;;  %v346_v52 = vld [vmem:[#allocation8 + $0x98] sm:$0xff]  ;;  %564 = vmatprep.subr.bf16.mxu0 %v563_v49  ;;  %v573_v1 = vpack.c.bf16 %v332_v62, %v331_v61  ;;  %v333_v3 = vld [vmem:[#allocation8 + $0x30] sm:$0xff]  ;;  %v351_v19 = vld [vmem:[#allocation8 + $0xc0] sm:$0xff] }
  0x67   :  { %v567_v54 = vpack.c.bf16 %v346_v52, %v345_v51  ;;  %566 = vmatpush3.bf16.msra.mxu0 %v565_v53  ;;  %v89_v9 = vld [vmem:[%s858_s2] sm:$0x3]  ;;  %v352_v20 = vld [vmem:[#allocation8 + $0xc8] sm:$0xff]  ;;  %v335_v22 = vld [vmem:[#allocation8 + $0x40] sm:$0xff] }
  0x68   :  { %v336_v23 = vld [vmem:[#allocation8 + $0x48] sm:$0xff]  ;;  %v353_v25 = vld [vmem:[#allocation8 + $0xd0] sm:$0xff]  ;;  %v354_v26 = vld [vmem:[#allocation8 + $0xd8] sm:$0xff] }
  0x69   :  { %526 = vmatpush1.bf16.msra.mxu1 %v525_v57  ;;  %v347_v57 = vld [vmem:[#allocation8 + $0xa0] sm:$0xff]  ;;  %568 = vmatprep.subr.bf16.mxu0 %v567_v54  ;;  %v337_v28 = vld [vmem:[#allocation8 + $0x50] sm:$0xff]  ;;  %v338_v29 = vld [vmem:[#allocation8 + $0x58] sm:$0xff] }
  0x6a   :  { %528 = vmatprep.subr.bf16.mxu1 %v527_v58  ;;  %v348_v58 = vld [vmem:[#allocation8 + $0xa8] sm:$0xff]  ;;  %v355_v31 = vld [vmem:[#allocation8 + $0xe0] sm:$0xff]  ;;  %v357_v36 = vld [vmem:[#allocation8 + $0xf0] sm:$0xff] }
  0x6b   :  { %v571_v60 = vpack.c.bf16 %v348_v58, %v347_v57  ;;  %570 = vmatpush3.bf16.msra.mxu0 %v569_v59  ;;  %v356_v32 = vld [vmem:[#allocation8 + $0xe8] sm:$0xff]  ;;  %v341_v40 = vld [vmem:[#allocation8 + $0x70] sm:$0xff]  ;;  %v242_v43 = vld [vmem:[%s860_s4] sm:$0x3]  ;;  %s443_s4 = sshll.u32 %s740_s30, 4  ;;  %s444_s4 = int_to_ptr.vmem [resolvable:$true] %s443_s4 }
  0x6c   :  { %v587_v34 = vpack.c.bf16 %v356_v32, %v355_v31  ;;  %v340_v35 = vld [vmem:[#allocation8 + $0x68] sm:$0xff]  ;;  %v455_v53 = vld [vmem:[%s862_s6] ss:$0 sm:$0xff]  ;;  %s701_s8 = scalar_lea.vmem %s444_s4, 128  ;;  %p706_p5 = scmp.lt.s32.totalorder %s444_s4, %s444_s4 }
  0x6d   :  { %530 = vmatpush1.bf16.msra.mxu1 %v529_v63  ;;  %v349_v63 = vld [vmem:[#allocation8 + $0xb0] sm:$0xff]  ;;  %572 = vmatprep.subr.bf16.mxu0 %v571_v60  ;;  %p702_p4 = scmp.ne.s32.totalorder %s444_s4, %s701_s8  ;;  %p707_p6 = scmp.lt.s32.totalorder %s701_s8, %s701_s8 }
  0x6e   :  { %532 = vmatprep.subr.bf16.mxu1 %v531_v0  ;;  %v350_v0 = vld [vmem:[#allocation8 + $0xb8] sm:$0xff] }
  0x6f   :  { %v575_v2 = vpack.c.bf16 %v350_v0, %v349_v63  ;;  %574 = vmatpush3.bf16.msra.mxu0 %v573_v1  ;;  %p708_p7 = por %p707_p6, %p706_p5 }
  0x71   :  { %534 = vmatpush1.bf16.msra.mxu1 %v533_v5  ;;  %v577_v5 = vpack.c.bf16 %v334_v4, %v333_v3  ;;  %576 = vmatprep.subr.bf16.mxu0 %v575_v2  ;;  %p709_p8 = pnand %p708_p7, %p702_p4 }
  0x72   :  { %536 = vmatprep.subr.bf16.mxu1 %v535_v6  ;;  %v91_v6 = vlaneseq }
  0x73   :  { %578 = vmatpush3.bf16.msra.mxu0 %v577_v5 }
  0x74   :  { %v92_v7 = vshrl.u32 %v91_v6, 7 }
  0x75   :  { %538 = vmatpush1.bf16.msra.mxu1 %v537_v11 }
  0x76   :  { %540 = vmatprep.subr.bf16.mxu1 %v539_v12  ;;  %v93_v8 = vsub.s32 0, %v92_v7  ;;  %v97_v10 = vsub.s32 1, %v92_v7 }
  0x78   :  { %v94_v11 = vrot.slane %v89_v9, %v93_v8  ;;  %v98_v12 = vrot.slane %v89_v9, %v97_v10  ;;  %v247_v44 = vrot.slane %v242_v43, %v93_v8 }
  0x79   :  { %542 = vmatpush1.bf16.msra.mxu1 %v541_v17 }
  0x7a   :  { %544 = vmatprep.subr.bf16.mxu1 %v543_v18 }
  0x7d   :  { %546 = vmatpush1.bf16.msra.mxu1 %v545_v21  ;;  %v579_v21 = vpack.c.bf16 %v352_v20, %v351_v19 }
  0x7e   :  { %548 = vmatprep.subr.bf16.mxu1 %v547_v24  ;;  %v581_v24 = vpack.c.bf16 %v336_v23, %v335_v22 }
  0x7f   :  { %580 = vmatprep.subr.bf16.mxu0 %v579_v21 }
  0x80   :  { %582 = vmatpush3.bf16.msra.mxu0 %v581_v24 }
  0x81   :  { %550 = vmatpush1.bf16.msra.mxu1 %v549_v27  ;;  %v583_v27 = vpack.c.bf16 %v354_v26, %v353_v25 }
  0x82   :  { %552 = vmatprep.subr.bf16.mxu1 %v551_v30  ;;  %v585_v30 = vpack.c.bf16 %v338_v29, %v337_v28 }
  0x83   :  { %584 = vmatprep.subr.bf16.mxu0 %v583_v27 }
  0x84   :  { %586 = vmatpush3.bf16.msra.mxu0 %v585_v30 }
  0x85   :  { %554 = vmatpush1.bf16.msra.mxu1 %v553_v33  ;;  %v339_v33 = vld [vmem:[#allocation8 + $0x60] sm:$0xff]  ;;  %588 = vmatprep.subr.bf16.mxu0 %v587_v34 }
  0x86   :  { %556 = vmatprep.subr.bf16.mxu1 %v555_v37  ;;  %v358_v37 = vld [vmem:[#allocation8 + $0xf8] sm:$0xff]  ;;  %v589_v38 = vpack.c.bf16 %v340_v35, %v339_v33 }
  0x87   :  { %v591_v39 = vpack.c.bf16 %v358_v37, %v357_v36 }
  0x88   :  { %590 = vmatpush3.bf16.msra.mxu0 %v589_v38 }
  0x89   :  { %558 = vmatpush1.bf16.msra.mxu1 %v557_v41  ;;  %v342_v41 = vld [vmem:[#allocation8 + $0x78] sm:$0xff]  ;;  %592 = vmatprep.subr.bf16.mxu0 %v591_v39 }
  0x8a   :  { %560 = vmatprep.subr.bf16.mxu1 %v559_v42  ;;  %v593_v42 = vpack.c.bf16 %v342_v41, %v341_v40 }
  0x8c   :  { %594 = vmatpush3.bf16.msra.mxu0 %v593_v42 }
  0x8d   :  { %562 = vmatpush1.bf16.msra.mxu1 %v561_v45  ;;  %v251_v45 = vrot.slane %v242_v43, %v97_v10 }
 0x128   :  { %v171_v13 = vpop.f32.mrb[0].mxu0 }
 0x129   :  { %v172_v14 = vadd.f32 %v171_v13, %v94_v11  ;;  %v173_v15 = vpop.f32.mrb[1].mxu0 }
 0x12a   :  { %v174_v16 = vadd.f32 %v173_v15, %v98_v12 }
 0x12c   :  { %605 = vtanh.f32 %v174_v16 }
 0x12d   :  { %607 = vtanh.f32 %v172_v14 }
 0x136   :  { %v606_v17 = vpop.eup %605 }
 0x137   :  { %v608_v18 = vpop.eup %607  ;;  %318 = vmatprep.mubr.f32.mxu1 %v606_v17 }
 0x138   :  { %319 = vmatmul.mubr.f32.vlgmr.msra.gmra.mrb[0].mxu1 %v608_v18 }
 0x20b   :  { %v320_v46 = vpop.f32.mrb[0].mxu1 }
 0x20c   :  { %v321_v47 = vadd.f32 %v320_v46, %v247_v44  ;;  %v322_v48 = vpop.f32.mrb[1].mxu1 }
 0x20d   :  { %v323_v49 = vadd.f32 %v322_v48, %v251_v45 }
 0x20f   :  { %609 = vtanh.f32 %v323_v49 }
 0x210   :  { %611 = vtanh.f32 %v321_v47 }
 0x219   :  { %v610_v50 = vpop.eup %609 }
 0x21a   :  { %v612_v51 = vpop.eup %611  ;;  %430 = vmatprep.mubr.f32.mxu0 %v610_v50 }
 0x21b   :  { %431 = vmatmul.mubr.f32.vlgmr.msra.gmra.mrb[2].mxu0 %v612_v51 }
 0x2ee   :  { %v488_v52 = vpop.f32.mrb[2].mxu0 }
 0x2ef   :  { %v489_v54 = vpop.f32.mrb[3].mxu0 }
 0x2f0   :  { %v490_v55 = vadd.f32 %v489_v54, %v488_v52 }
 0x2f2   :  { %v433_v56 = vadd.f32 %v490_v55, %v455_v53 }
 0x2f4   :  { %436 = vst [vmem:[#allocation10] sm:$0xff] %v433_v56 }
 0x2f5   :  { %712 = shalt.err (!%p709_p8)
}
 0x2f6   :  { %s713_s13 = scalar_lea.hbm %s863_s7, 128 }
 0x2f7   :  { %p714_p9 = scmp.ne.s32.totalorder %s863_s7, %s713_s13  ;;  %p717_p10 = scmp.lt.u32.totalorder %s713_s13, %s863_s7 }
 0x2f9   :  { %p719_p11 = pnand %p717_p10, %p714_p9 }
 0x2fb   :  { %722 = shalt.err (!%p719_p11)
}
 0x2fc   :  { %446 = dma.vmem_to_hbm [thread:$0]  %s444_s4, 128, %s863_s7, [#allocation4]  }
 0x2fd   :  { %729 = dma.done.wait [#allocation4], 128  }
 0x2fe   :  { %730 = vsyncadd [#allocation4], 4294967168 }
 0x2ff   :  { %450 = vsyncpa [#allocation3], 1 }
 0x300   :  { %451 = vsyncpa [#allocation6], 1 }
 0x301   :  { %452 = vsyncpa [#allocation9], 1 }
 0x302   :  { %453 = vsyncpa [#allocation4], 1 }

</bundles_post_ra>
